<compile_context>
chip_gen: v5e
topology: v5e:2x2
jax: 0.10.0
libtpu: 0.0.40
codegen_flags: <defaults>
</compile_context>

<pallas_src>
import functools

import jax
import jax.numpy as jnp
from jax.experimental import pallas as pl
from jax.experimental.pallas import tpu as pltpu


# ----------------------------- kernel ----------------------------------------

def _complex_conv3x3_relu_kernel(x_ref, w_ref, y_ref):
    # x_ref: (tile_h+2, W+2, 2*Cin)   halo'd input tile, real||imag on channels
    # w_ref: (9*2*Cin, 2*Cout)        complex weight, all 9 taps stacked along K
    # y_ref: (tile_h*W, 2*Cout)       output rows for this tile
    tile_h = x_ref.shape[0] - 2
    W = x_ref.shape[1] - 2
    c2in = x_ref.shape[2]

    x = x_ref[...]
    taps = []
    for kh in range(3):                      # static 3x3 unroll -> im2col in VMEM
        for kw in range(3):
            xs = x[kh:kh + tile_h, kw:kw + W, :]          # (tile_h, W, 2*Cin)
            taps.append(xs.reshape(tile_h * W, c2in))
    xcat = jnp.concatenate(taps, axis=-1)                 # (tile_h*W, 18*Cin)

    # single MXU dot: complex conv (all 9 taps, real+imag) in one contraction
    acc = jnp.dot(xcat, w_ref[...], preferred_element_type=jnp.float32)
    # fused CReLU epilogue
    y_ref[...] = jnp.maximum(acc, 0.0).astype(y_ref.dtype)


# ----------------------------- wrapper ----------------------------------------

def _pick_tile_h(H, W, c2in, c2out, budget_bytes=4 * 1024 * 1024):
    """Largest row-tile whose per-step working set fits a conservative budget
    (keeps double-buffered blocks well inside v7x's 64 MiB VMEM)."""
    def tile_bytes(t):
        return 4 * ((t + 2) * (W + 2) * c2in          # halo'd input slab
                    + t * W * (9 * c2in)              # in-kernel im2col slab
                    + 2 * t * W * c2out)              # f32 acc + output block
    for t in (H, 256, 128, 64, 32, 16, 8):
        if t <= H and tile_bytes(t) <= budget_bytes:
            return t
    return min(8, H)


def complex_conv3x3_crelu(x, w_real, w_imag, *, tile_h=None):
    """Basic_Block forward.

    x:       (b, Cin, H, W, 2) with [..., 0]=real, [..., 1]=imag
    w_real:  (Cout, Cin, 3, 3)  weights of the `real` Conv2d (torch OIHW)
    w_imag:  (Cout, Cin, 3, 3)  weights of the `imag` Conv2d
    returns: (b, Cout, H, W, 2) = ReLU(ComplexConv(x))
    """
    b, cin, H, W, two = x.shape
    assert two == 2
    cout = w_real.shape[0]
    c2in, c2out = 2 * cin, 2 * cout
    out_dtype = x.dtype

    # channels-last, real & imag stacked on the channel axis: (b, H, W, 2*Cin)
    xr = jnp.transpose(x[..., 0], (0, 2, 3, 1))
    xi = jnp.transpose(x[..., 1], (0, 2, 3, 1))
    x2 = jnp.concatenate([xr, xi], axis=-1).astype(jnp.float32)

    # combined complex weight per tap: [yr, yi] = [xr, xi] @ [[Wr, Wi], [-Wi, Wr]]
    wr = jnp.transpose(w_real, (2, 3, 1, 0)).astype(jnp.float32)   # (3,3,Cin,Cout)
    wi = jnp.transpose(w_imag, (2, 3, 1, 0)).astype(jnp.float32)
    w_big = jnp.concatenate(
        [jnp.concatenate([wr, wi], axis=-1),
         jnp.concatenate([-wi, wr], axis=-1)], axis=-2)            # (3,3,2Cin,2Cout)
    w_flat = w_big.reshape(9 * c2in, c2out)                        # taps stacked on K

    if tile_h is None:
        tile_h = _pick_tile_h(H, W, c2in, c2out)
    tile_h = max(1, min(int(tile_h), H))
    n_tiles = -(-H // tile_h)                 # cdiv
    Hpad = n_tiles * tile_h

    # zero-pad: 1-row/col conv halo + extra bottom rows (discarded after the call)
    x_pad = jnp.pad(x2, ((0, 0), (1, 1 + (Hpad - H)), (1, 1), (0, 0)))
    # pre-built halo'd row tiles -> plain Blocked BlockSpecs, full pipelining
    x_tiles = jnp.stack(
        [x_pad[:, t * tile_h: t * tile_h + tile_h + 2] for t in range(n_tiles)],
        axis=1)                                                    # (b, nT, tH+2, W+2, 2Cin)

    Wp = W + 2
    out_shape = jax.ShapeDtypeStruct((b, n_tiles, tile_h * W, c2out), jnp.float32)

    flops = 2 * b * Hpad * W * (9 * c2in) * c2out
    bytes_accessed = 4 * (x_tiles.size + w_flat.size + b * Hpad * W * c2out)

    y = pl.pallas_call(
        _complex_conv3x3_relu_kernel,
        out_shape=out_shape,
        grid=(b, n_tiles),
        in_specs=[
            pl.BlockSpec((None, None, tile_h + 2, Wp, c2in),
                         lambda bi, ti: (bi, ti, 0, 0, 0)),
            pl.BlockSpec((9 * c2in, c2out), lambda bi, ti: (0, 0)),
        ],
        out_specs=pl.BlockSpec((None, None, tile_h * W, c2out),
                               lambda bi, ti: (bi, ti, 0, 0)),
        compiler_params=pltpu.CompilerParams(
            dimension_semantics=("parallel", "parallel"),
            vmem_limit_bytes=48 * 1024 * 1024,
        ),
        cost_estimate=pl.CostEstimate(flops=flops, transcendentals=0,
                                      bytes_accessed=bytes_accessed),
    )(x_tiles, w_flat)

    # (b, nT, tile_h*W, 2Cout) -> (b, Hpad, W, 2Cout) -> drop padded rows
    y = y.reshape(b, Hpad, W, c2out)[:, :H]
    yr = jnp.transpose(y[..., :cout], (0, 3, 1, 2))
    yi = jnp.transpose(y[..., cout:], (0, 3, 1, 2))
    return jnp.stack([yr, yi], axis=-1).astype(out_dtype)


# --------------------------- pure-JAX reference --------------------------------

def _ref_basic_block(x, w_real, w_imag):
    xr, xi = x[..., 0], x[..., 1]
    conv = lambda inp, w: jax.lax.conv_general_dilated(
        inp, w, window_strides=(1, 1), padding=((1, 1), (1, 1)),
        dimension_numbers=("NCHW", "OIHW", "NCHW"))
    yr = conv(xr, w_real) - conv(xi, w_imag)
    yi = conv(xr, w_imag) + conv(xi, w_real)
    return jnp.maximum(jnp.stack([yr, yi], axis=-1), 0.0)


# ----------------------------------- main ---------------------------------------

if __name__ == "__main__":
    key = jax.random.PRNGKey(0)
    kx, kr, ki = jax.random.split(key, 3)

    b, cin, cout, H, W = 2, 4, 8, 16, 16
    x = jax.random.normal(kx, (b, cin, H, W, 2), jnp.float32)
    w_real = jax.random.normal(kr, (cout, cin, 3, 3), jnp.float32) / jnp.sqrt(9.0 * cin)
    w_imag = jax.random.normal(ki, (cout, cin, 3, 3), jnp.float32) / jnp.sqrt(9.0 * cin)

    # tile_h=8 -> grid (b=2, n_tiles=2): exercises the tiled / pipelined path
    fwd = jax.jit(functools.partial(complex_conv3x3_crelu, tile_h=8))
    out = jax.block_until_ready(fwd(x, w_real, w_imag))

    ref = _ref_basic_block(x, w_real, w_imag)
    assert out.shape == (b, cout, H, W, 2) and out.dtype == jnp.float32
    assert bool(jnp.all(jnp.isfinite(out)))
    max_err = float(jnp.max(jnp.abs(out - ref)))
    assert max_err < 1e-4, f"mismatch vs pure-JAX reference: {max_err}"
    print("KERNEL_OK")
</pallas_src>

<mosaic_0001>
module attributes {stable_mosaic.version = 11 : i64} {
  func.func @_complex_conv3x3_relu_kernel(%arg0: i32, %arg1: i32, %arg2: memref<1x1x10x18x8xf32, #tpu.memory_space<vmem>>, %arg3: memref<72x16xf32, #tpu.memory_space<vmem>>, %arg4: memref<1x1x128x16xf32, #tpu.memory_space<vmem>>) attributes {dimension_semantics = [#tpu.dimension_semantics<parallel>, #tpu.dimension_semantics<parallel>], iteration_bounds = array<i64: 2, 2>, scalar_prefetch = 0 : i64, scratch_operands = 0 : i64, tpu.core_type = #tpu.core_type<tc>, window_params = [{transform_indices = @transform_0, window_bounds = array<i64: 1, 1, 10, 18, 8>}, {pipeline_mode = #tpu.pipeline_mode<synchronous>, transform_indices = @transform_1, window_bounds = array<i64: 72, 16>}, {transform_indices = @transform_2, window_bounds = array<i64: 1, 1, 128, 16>}]} {
    %c0 = arith.constant 0 : index
    %c0_0 = arith.constant 0 : index
    %c0_1 = arith.constant 0 : index
    %c0_2 = arith.constant 0 : index
    %c0_3 = arith.constant 0 : index
    %0 = vector.load %arg2[%c0, %c0_0, %c0_1, %c0_2, %c0_3] : memref<1x1x10x18x8xf32, #tpu.memory_space<vmem>>, vector<1x1x10x18x8xf32>
    %1 = vector.shape_cast %0 : vector<1x1x10x18x8xf32> to vector<10x18x8xf32>
    %2 = vector.extract_strided_slice %1 {offsets = [0, 0, 0], sizes = [8, 16, 8], strides = [1, 1, 1]} : vector<10x18x8xf32> to vector<8x16x8xf32>
    %3 = vector.shape_cast %2 : vector<8x16x8xf32> to vector<128x8xf32>
    %4 = vector.extract_strided_slice %1 {offsets = [0, 1, 0], sizes = [8, 16, 8], strides = [1, 1, 1]} : vector<10x18x8xf32> to vector<8x16x8xf32>
    %5 = vector.shape_cast %4 : vector<8x16x8xf32> to vector<128x8xf32>
    %6 = vector.extract_strided_slice %1 {offsets = [0, 2, 0], sizes = [8, 16, 8], strides = [1, 1, 1]} : vector<10x18x8xf32> to vector<8x16x8xf32>
    %7 = vector.shape_cast %6 : vector<8x16x8xf32> to vector<128x8xf32>
    %8 = vector.extract_strided_slice %1 {offsets = [1, 0, 0], sizes = [8, 16, 8], strides = [1, 1, 1]} : vector<10x18x8xf32> to vector<8x16x8xf32>
    %9 = vector.shape_cast %8 : vector<8x16x8xf32> to vector<128x8xf32>
    %10 = vector.extract_strided_slice %1 {offsets = [1, 1, 0], sizes = [8, 16, 8], strides = [1, 1, 1]} : vector<10x18x8xf32> to vector<8x16x8xf32>
    %11 = vector.shape_cast %10 : vector<8x16x8xf32> to vector<128x8xf32>
    %12 = vector.extract_strided_slice %1 {offsets = [1, 2, 0], sizes = [8, 16, 8], strides = [1, 1, 1]} : vector<10x18x8xf32> to vector<8x16x8xf32>
    %13 = vector.shape_cast %12 : vector<8x16x8xf32> to vector<128x8xf32>
    %14 = vector.extract_strided_slice %1 {offsets = [2, 0, 0], sizes = [8, 16, 8], strides = [1, 1, 1]} : vector<10x18x8xf32> to vector<8x16x8xf32>
    %15 = vector.shape_cast %14 : vector<8x16x8xf32> to vector<128x8xf32>
    %16 = vector.extract_strided_slice %1 {offsets = [2, 1, 0], sizes = [8, 16, 8], strides = [1, 1, 1]} : vector<10x18x8xf32> to vector<8x16x8xf32>
    %17 = vector.shape_cast %16 : vector<8x16x8xf32> to vector<128x8xf32>
    %18 = vector.extract_strided_slice %1 {offsets = [2, 2, 0], sizes = [8, 16, 8], strides = [1, 1, 1]} : vector<10x18x8xf32> to vector<8x16x8xf32>
    %19 = vector.shape_cast %18 : vector<8x16x8xf32> to vector<128x8xf32>
    %20 = tpu.concatenate %3, %5, %7, %9, %11, %13, %15, %17, %19 in 1 : vector<128x8xf32>, vector<128x8xf32>, vector<128x8xf32>, vector<128x8xf32>, vector<128x8xf32>, vector<128x8xf32>, vector<128x8xf32>, vector<128x8xf32>, vector<128x8xf32> -> vector<128x72xf32>
    %c0_4 = arith.constant 0 : index
    %c0_5 = arith.constant 0 : index
    %21 = vector.load %arg3[%c0_4, %c0_5] : memref<72x16xf32, #tpu.memory_space<vmem>>, vector<72x16xf32>
    %cst = arith.constant dense<0.000000e+00> : vector<128x16xf32>
    %22 = tpu.matmul %20, %21, %cst {dimension_numbers = #tpu.dot_dimension_numbers<[1], [0], [0], [1], [0, 0, 1, 1], [], []>} : vector<128x72xf32>, vector<72x16xf32>, vector<128x16xf32> -> vector<128x16xf32>
    %cst_6 = arith.constant 0.000000e+00 : f32
    %23 = vector.broadcast %cst_6 : f32 to vector<128x16xf32>
    %24 = arith.maximumf %22, %23 : vector<128x16xf32>
    %c0_7 = arith.constant 0 : index
    %c0_8 = arith.constant 0 : index
    %c0_9 = arith.constant 0 : index
    %c0_10 = arith.constant 0 : index
    %25 = vector.load %arg4[%c0_7, %c0_8, %c0_9, %c0_10] : memref<1x1x128x16xf32, #tpu.memory_space<vmem>>, vector<1x1x128x16xf32>
    %26 = vector.shape_cast %25 : vector<1x1x128x16xf32> to vector<128x16xf32>
    %27 = vector.shape_cast %24 : vector<128x16xf32> to vector<1x1x128x16xf32>
    tpu.vector_store %arg4[%c0_7, %c0_8, %c0_9, %c0_10], %27 {strides = array<i32>} : memref<1x1x128x16xf32, #tpu.memory_space<vmem>>, vector<1x1x128x16xf32>,
    return
  }
  func.func @transform_0(%arg0: i32, %arg1: i32) -> (i32, i32, i32, i32, i32) {
    %c0_i32 = arith.constant 0 : i32
    %c0_i32_0 = arith.constant 0 : i32
    %c0_i32_1 = arith.constant 0 : i32
    %c0_i32_2 = arith.constant 0 : i32
    return %arg0, %arg1, %c0_i32, %c0_i32_0, %c0_i32_1 : i32, i32, i32, i32, i32
  }
  func.func @transform_1(%arg0: i32, %arg1: i32) -> (i32, i32) {
    %c0_i32 = arith.constant 0 : i32
    %c0_i32_0 = arith.constant 0 : i32
    %c0_i32_1 = arith.constant 0 : i32
    return %c0_i32, %c0_i32_0 : i32, i32
  }
  func.func @transform_2(%arg0: i32, %arg1: i32) -> (i32, i32, i32, i32) {
    %c0_i32 = arith.constant 0 : i32
    %c0_i32_0 = arith.constant 0 : i32
    %c0_i32_1 = arith.constant 0 : i32
    return %arg0, %arg1, %c0_i32, %c0_i32_0 : i32, i32, i32, i32
  }
}

</mosaic_0001>

<bundles_post_ra>
// kernel: complex_conv3x3_crelu.1
= control target key start
LH: loop header
LB: loop body
LE: loop exit
PB: predicated region body
PF: predicated region fallthrough
CT: control target
= control target key end

     0   :  { %s1279_s9 = smov 0   ;;  %s1281_s10 = smov 0   ;;  %s2163_s0 = inlined_call_operand.vmem [shape: f32[2,2,10,18,8], index: 0, kind: input, shape index: {}]   ;;  %s2164_s1 = inlined_call_operand.vmem [shape: f32[72,16], index: 1, kind: input, shape index: {}]   ;;  %s2165_s2 = inlined_call_operand.vmem [shape: f32[2,2,128,16], index: 2, kind: output, shape index: {}]  }
   0x1   :  { %s1283_s11 = smov 0   ;;  %s1285_s12 = smov 0  }
   0x2   :  { %s1287_s13 = smov 0  }
   0x3 LB: > { %s21_s14 = sadd.s32 1, %s1246_s11  ;;  %s24_s15 = sadd.s32 1, %s1250_s12  ;;  %s1254_s13 = sphi %s1287_s13, %s12_s13   ;;  %s1250_s12 = sphi %s1285_s12, %s2178_s12   ;;  %s1246_s11 = sphi %s1283_s11, %s2177_s11   ;;  %s1242_s10 = sphi %s1281_s10, %s2176_s10   ;;  %s1238_s9 = sphi %s1279_s9, %s2175_s9  }
   0x4   : > { %p22_p0 = scmp.ge.s32.totalorder %s21_s14, 2  ;;  %p1116_p1 = scmp.ge.s32.totalorder %s1254_s13, 1 }
   0x5   : > { %p132_p2 = scmp.lt.s32.totalorder %s1254_s13, 5 }
   0x6   : > { %s2180_s14 = smov (%p22_p0, %s21_s14), 0  ;;  %s2182_s15 = smov (!%p22_p0, %s24_s15), %s1250_s12 }
   0x7   : > { %p133_p3 = pnand %p1116_p1, %p132_p2  ;;  %p26_p4 = scmp.ge.s32.totalorder %s2182_s15, 2 }
   0x9   : > { %s2184_s15 = smov (%p26_p4, %s2182_s15), 0  ;;  %136 = sbr.rel (%p133_p3) target bundleno = 610 (0x262), region = 28 }
   0xe   : > { %p162_p5 = scmp.lt.s32.totalorder %s1242_s10, 1  ;;  %p164_p6 = scmp.lt.s32.totalorder %s1238_s9, 1  ;;  %vm234_vm0 = vcmask 1046528   ;;  %vm275_vm1 = vcmask 1045504   ;;  %vm743_vm2 = vcmask 130048   ;;  %vm726_vm3 = vcmask 64512  }
   0xf   : > { %s1256_s23 = smov 8   ;;  %s1257_s24 = smov 16   ;;  %vm760_vm4 = vcmask 195584   ;;  %vm777_vm5 = vcmask 261120   ;;  %vm794_vm6 = vcmask 326656   ;;  %vm811_vm7 = vcmask 392192  }
  0x10   : > { %s2186_s10 = smov (!%p162_p5, %s1242_s10), 1  ;;  %s2188_s9 = smov (!%p164_p6, %s1238_s9), 1  ;;  %vm828_vm8 = vcmask 457728   ;;  %vm845_vm9 = vcmask 523264   ;;  %vm871_vm10 = vcmask 588800  }
  0x11   : > { %s1167_s16 = smul.u32 60, %s2186_s10  ;;  %s1258_s25 = smov 24  }
  0x12   : > { %s1166_s17 = smul.u32 30, %s2188_s9  ;;  %s1259_s26 = smov 32  }
  0x13   : > { %s1260_s27 = smov 40   ;;  %s1261_s28 = smov 56  }
  0x14   : > { %s168_s18 = sadd.s32 %s1167_s16, %s1166_s17  ;;  %s1262_s29 = smov 48  }
  0x15   : > { %s1117_s19 = sshll.u32 %s168_s18, 3  ;;  %s1263_s30 = smov 64  }
  0x16   : > { %s1318_s22 = scalar_lea.vmem %s2163_s0, %s1117_s19 }
  0x17   : > { %v1321_v0 = vld [vmem:[%s1318_s22 + $0x30] sm:$0xff]  ;;  %v1324_v1 = vld [vmem:[%s1318_s22 + $0x38] sm:$0xff]  ;;  %v1332_v5 = vld [vmem:[%s1318_s22 + $0x20] sm:$0xff] }
  0x18   : > { %v1327_v2 = vld [vmem:[%s1318_s22 + $0x18] sm:$0xff]  ;;  %v245_v3 = vrot.slane %v1321_v0, 1  ;;  %v246_v4 = vrot.slane %v1324_v1, 1  ;;  %v1336_v7 = vld [vmem:[%s1318_s22] sm:$0xff]  ;;  %v1339_v8 = vld [vmem:[%s1318_s22 + $0x8] sm:$0xff]  ;;  %v241_v9 = vrot.slane %v1332_v5, 1 }
  0x19   : > { %v240_v6 = vrot.slane %v1327_v2, 1  ;;  %v235_v10 = vrot.slane %v1336_v7, 1  ;;  %v236_v11 = vrot.slane %v1339_v8, 1  ;;  %v1345_v12 = vld [vmem:[%s1318_s22 + $0x40] sm:$0x3]  ;;  %v1379_v25 = vld [vmem:[%s1318_s22 + $0x68] sm:$0xff] }
  0x1a   : > { %v1348_v13 = vsel %vm234_vm0, %v245_v3, %v246_v4  ;;  %v1351_v14 = vld [vmem:[%s1318_s22 + $0x28] sm:$0x3]  ;;  %v1354_v15 = vld [vmem:[%s1318_s22 + $0x10] sm:$0x3]  ;;  %v248_v18 = vrot.slane %v1345_v12, 1  ;;  %v1376_v24 = vld [vmem:[%s1318_s22 + $0x60] sm:$0xff] }
  0x1b   : > { %350 = vrot.lane.b32.xlu2 %v1348_v13, %s1256_s23  ;;  %v1359_v16 = vsel %vm234_vm0, %v240_v6, %v241_v9  ;;  %v237_v17 = vsel %vm234_vm0, %v235_v10, %v236_v11  ;;  %v243_v19 = vrot.slane %v1351_v14, 1  ;;  %v238_v20 = vrot.slane %v1354_v15, 1  ;;  %v1382_v26 = vld [vmem:[%s1318_s22 + $0x50] sm:$0xff]  ;;  %v1385_v27 = vld [vmem:[%s1318_s22 + $0x58] sm:$0x3]  ;;  %v1388_v28 = vld [vmem:[%s1318_s22 + $0x48] sm:$0xff] }
  0x1c   : > { %346 = vrot.lane.b32.xlu1 %v1359_v16, %s1256_s23  ;;  %342 = vrot.lane.b32.xlu0 %v237_v17, %s1256_s23  ;;  %v1369_v21 = vsel %vm234_vm0, %v246_v4, %v248_v18  ;;  %2169 = vst [vmem:[#allocation2_spill] sm:$0xff] %v1382_v26  ;;  %v255_v29 = vrot.slane %v1376_v24, 1  ;;  %v256_v30 = vrot.slane %v1379_v25, 1  ;;  %v251_v31 = vrot.slane %v1382_v26, 1  ;;  %v1410_v37 = vld [vmem:[%s1318_s22 + $0x80] sm:$0xff]  ;;  %v1416_v39 = vld [vmem:[%s1318_s22 + $0x78] sm:$0xff] }
  0x1d   : > { %v1372_v22 = vsel %vm234_vm0, %v241_v9, %v243_v19  ;;  %v239_v23 = vsel %vm234_vm0, %v236_v11, %v238_v20  ;;  %v253_v32 = vrot.slane %v1385_v27, 1  ;;  %v250_v33 = vrot.slane %v1388_v28, 1  ;;  %v1413_v38 = vld [vmem:[%s1318_s22 + $0x88] sm:$0x3]  ;;  %v1419_v40 = vld [vmem:[%s1318_s22 + $0x70] sm:$0x3] }
  0x1e   : > { %v1401_v34 = vsel %vm234_vm0, %v255_v29, %v256_v30  ;;  %v261_v41 = vrot.slane %v1410_v37, 1  ;;  %v263_v42 = vrot.slane %v1413_v38, 1  ;;  %v260_v43 = vrot.slane %v1416_v39, 1  ;;  %v1441_v48 = vld [vmem:[%s1318_s22 + $0xa8] sm:$0xff]  ;;  %v1444_v49 = vld [vmem:[%s1318_s22 + $0xb0] sm:$0xff]  ;;  %v1447_v50 = vld [vmem:[%s1318_s22 + $0x98] sm:$0xff] }
  0x1f   : > { %v1404_v35 = vsel %vm234_vm0, %v251_v31, %v253_v32  ;;  %v1407_v36 = vsel %vm234_vm0, %v250_v33, %v251_v31  ;;  %v258_v44 = vrot.slane %v1419_v40, 1  ;;  %v1450_v51 = vld [vmem:[%s1318_s22 + $0xa0] sm:$0x3]  ;;  %v1453_v52 = vld [vmem:[%s1318_s22 + $0x90] sm:$0xff]  ;;  %v270_v53 = vrot.slane %v1441_v48, 1 }
  0x20   : > { %2170 = vst [vmem:[#allocation3_spill] sm:$0xff] %v1404_v35  ;;  %v1432_v45 = vsel %vm234_vm0, %v261_v41, %v263_v42  ;;  %v1435_v46 = vsel %vm234_vm0, %v260_v43, %v261_v41  ;;  %v271_v54 = vrot.slane %v1444_v49, 1  ;;  %v266_v55 = vrot.slane %v1447_v50, 1  ;;  %v1476_v61 = vld [vmem:[%s1318_s22 + $0xb8] sm:$0x3] }
  0x21   : > { %2171 = vst [vmem:[#allocation4_spill] sm:$0xff] %v1432_v45  ;;  %v1438_v47 = vsel %vm234_vm0, %v256_v30, %v258_v44  ;;  %v268_v56 = vrot.slane %v1450_v51, 1  ;;  %v265_v57 = vrot.slane %v1453_v52, 1  ;;  %v277_v62 = vrot.slane %v1339_v8, 2 }
  0x22   : > { %v1467_v58 = vsel %vm234_vm0, %v270_v53, %v271_v54  ;;  %v279_v63 = vrot.slane %v1354_v15, 2  ;;  %v276_v3 = vrot.slane %v1336_v7, 2  ;;  %v273_v4 = vrot.slane %v1476_v61, 1 }
  0x23   : > { %352 = vrot.lane.b32.xlu2 %v1369_v21, %s1256_s23  ;;  %v1470_v59 = vsel %vm234_vm0, %v266_v55, %v268_v56  ;;  %v1473_v60 = vsel %vm234_vm0, %v265_v57, %v266_v55  ;;  %v286_v11 = vrot.slane %v1321_v0, 2  ;;  %v287_v15 = vrot.slane %v1324_v1, 2 }
  0x24   : > { %348 = vrot.lane.b32.xlu1 %v1372_v22, %s1256_s23  ;;  %344 = vrot.lane.b32.xlu0 %v239_v23, %s1256_s23  ;;  %v280_v6 = vsel %vm275_vm1, %v277_v62, %v279_v63  ;;  %v278_v9 = vsel %vm275_vm1, %v276_v3, %v277_v62  ;;  %v1491_v10 = vsel %vm234_vm0, %v271_v54, %v273_v4  ;;  %v282_v17 = vrot.slane %v1332_v5, 2 }
  0x25   : > { %v284_v18 = vrot.slane %v1351_v14, 2  ;;  %v281_v19 = vrot.slane %v1327_v2, 2  ;;  %v1503_v20 = vsel %vm275_vm1, %v286_v11, %v287_v15  ;;  %v292_v14 = vrot.slane %v1382_v26, 2 }
  0x26   : > { %v294_v30 = vrot.slane %v1385_v27, 2  ;;  %v291_v31 = vrot.slane %v1388_v28, 2  ;;  %v289_v32 = vrot.slane %v1345_v12, 2  ;;  %v301_v12 = vrot.slane %v1416_v39, 2 }
  0x27   : > { %v1506_v23 = vsel %vm275_vm1, %v282_v17, %v284_v18  ;;  %v1509_v29 = vsel %vm275_vm1, %v281_v19, %v282_v17  ;;  %v302_v27 = vrot.slane %v1410_v37, 2  ;;  %v297_v43 = vrot.slane %v1379_v25, 2 }
  0x28   : > { %v1522_v33 = vsel %vm275_vm1, %v292_v14, %v294_v30  ;;  %v1525_v41 = vsel %vm275_vm1, %v291_v31, %v292_v14  ;;  %v1528_v42 = vsel %vm275_vm1, %v287_v15, %v289_v32  ;;  %v299_v44 = vrot.slane %v1419_v40, 2  ;;  %v1608_v31 = vld [vmem:[%s1318_s22 + $0xc8] sm:$0xff]  ;;  %v1611_v32 = vld [vmem:[%s1318_s22 + $0xc0] sm:$0xff] }
  0x29   : > { %v296_v53 = vrot.slane %v1376_v24, 2  ;;  %v1542_v54 = vsel %vm275_vm1, %v301_v12, %v302_v27  ;;  %v307_v40 = vrot.slane %v1447_v50, 2  ;;  %v309_v57 = vrot.slane %v1450_v51, 2 }
  0x2a   : > { %v1545_v55 = vsel %vm275_vm1, %v297_v43, %v299_v44  ;;  %v306_v62 = vrot.slane %v1453_v52, 2  ;;  %v304_v63 = vrot.slane %v1413_v38, 2  ;;  %v312_v38 = vrot.slane %v1444_v49, 2 }
  0x2b   : > { %358 = vrot.lane.b32.xlu2 %v1401_v34, %s1256_s23  ;;  %v1548_v56 = vsel %vm275_vm1, %v296_v53, %v297_v43  ;;  %v1561_v3 = vsel %vm275_vm1, %v307_v40, %v309_v57  ;;  %v314_v51 = vrot.slane %v1476_v61, 2 }
  0x2c   : > { %356 = vrot.lane.b32.xlu1 %v1404_v35, %s1256_s23  ;;  %354 = vrot.lane.b32.xlu0 %v1407_v36, %s1256_s23  ;;  %v1564_v4 = vsel %vm275_vm1, %v306_v62, %v307_v40 }
  0x2d   : > { %v1579_v11 = vsel %vm275_vm1, %v312_v38, %v314_v51 }
  0x33   : > { %364 = vrot.lane.b32.xlu2 %v1432_v45, %s1256_s23 }
  0x34   : > { %362 = vrot.lane.b32.xlu1 %v1435_v46, %s1256_s23  ;;  %360 = vrot.lane.b32.xlu0 %v1438_v47, %s1256_s23 }
  0x3b   : > { %370 = vrot.lane.b32.xlu2 %v1467_v58, %s1256_s23 }
  0x3c   : > { %368 = vrot.lane.b32.xlu1 %v1470_v59, %s1256_s23  ;;  %366 = vrot.lane.b32.xlu0 %v1473_v60, %s1256_s23 }
  0x43   : > { %392 = vrot.lane.b32.xlu2 %v280_v6, %s1257_s24  ;;  %v1567_v6 = vsel %vm275_vm1, %v302_v27, %v304_v63 }
  0x44   : > { %390 = vrot.lane.b32.xlu1 %v278_v9, %s1257_s24  ;;  %372 = vrot.lane.b32.xlu0 %v1491_v10, %s1256_s23  ;;  %v311_v9 = vrot.slane %v1441_v48, 2 }
  0x46   : > { %v1582_v15 = vsel %vm275_vm1, %v311_v9, %v312_v38 }
  0x4b   : > { %398 = vrot.lane.b32.xlu2 %v1503_v20, %s1257_s24 }
  0x4c   : > { %396 = vrot.lane.b32.xlu1 %v1506_v23, %s1257_s24  ;;  %394 = vrot.lane.b32.xlu0 %v1509_v29, %s1257_s24 }
  0x53   : > { %404 = vrot.lane.b32.xlu2 %v1522_v33, %s1257_s24 }
  0x54   : > { %402 = vrot.lane.b32.xlu1 %v1525_v41, %s1257_s24  ;;  %400 = vrot.lane.b32.xlu0 %v1528_v42, %s1257_s24 }
  0x5b   : > { %410 = vrot.lane.b32.xlu2 %v1542_v54, %s1257_s24 }
  0x5c   : > { %408 = vrot.lane.b32.xlu1 %v1545_v55, %s1257_s24  ;;  %406 = vrot.lane.b32.xlu0 %v1548_v56, %s1257_s24 }
  0x63   : > { %416 = vrot.lane.b32.xlu2 %v1561_v3, %s1257_s24 }
  0x64   : > { %414 = vrot.lane.b32.xlu1 %v1564_v4, %s1257_s24  ;;  %412 = vrot.lane.b32.xlu0 %v1567_v6, %s1257_s24 }
  0x6b   : > { %438 = vrot.lane.b32.xlu2 %v1327_v2, %s1258_s25 }
  0x6c   : > { %420 = vrot.lane.b32.xlu1 %v1579_v11, %s1257_s24  ;;  %418 = vrot.lane.b32.xlu0 %v1582_v15, %s1257_s24 }
  0x73   : > { %444 = vrot.lane.b32.xlu2 %v1324_v1, %s1258_s25 }
  0x74   : > { %442 = vrot.lane.b32.xlu1 %v1321_v0, %s1258_s25  ;;  %440 = vrot.lane.b32.xlu0 %v1332_v5, %s1258_s25 }
  0x75   : > { %v351_v61 = vpop.permute.xlu2 %350 }
  0x7b   : > { %450 = vrot.lane.b32.xlu2 %v1376_v24, %s1258_s25 }
  0x7c   : > { %448 = vrot.lane.b32.xlu1 %v1382_v26, %s1258_s25  ;;  %446 = vrot.lane.b32.xlu0 %v1388_v28, %s1258_s25 }
  0x7d   : > { %v1595_v17 = vpop.permute.xlu2 %352 }
  0x83   : > { %456 = vrot.lane.b32.xlu2 %v1410_v37, %s1258_s25 }
  0x84   : > { %454 = vrot.lane.b32.xlu1 %v1416_v39, %s1258_s25  ;;  %452 = vrot.lane.b32.xlu0 %v1379_v25, %s1258_s25 }
  0x85   : > { %v1600_v18 = vpop.permute.xlu2 %358 }
  0x8b   : > { %462 = vrot.lane.b32.xlu2 %v1441_v48, %s1258_s25 }
  0x8c   : > { %460 = vrot.lane.b32.xlu1 %v1447_v50, %s1258_s25  ;;  %458 = vrot.lane.b32.xlu0 %v1453_v52, %s1258_s25 }
  0x8d   : > { %v1605_v19 = vpop.permute.xlu2 %364 }
  0x8e   : > { %v347_v14 = vpop.permute.xlu1 %346  ;;  %v343_v30 = vpop.permute.xlu0 %342 }
  0x93   : > { %468 = vrot.lane.b32.xlu2 %v1608_v31, %s1258_s25 }
  0x94   : > { %466 = vrot.lane.b32.xlu1 %v1611_v32, %s1258_s25  ;;  %464 = vrot.lane.b32.xlu0 %v1444_v49, %s1258_s25 }
  0x95   : > { %v1616_v12 = vpop.permute.xlu2 %370 }
  0x96   : > { %v349_v27 = vpop.permute.xlu1 %348  ;;  %v345_v43 = vpop.permute.xlu0 %344 }
  0x97   : > { %v728_v44 = vsel %vm726_vm3, %v1339_v8, %v345_v43 }
  0x9b   : > { %490 = vrot.lane.b32.xlu2 %v1348_v13, %s1259_s26 }
  0x9c   : > { %488 = vrot.lane.b32.xlu1 %v1372_v22, %s1259_s26  ;;  %486 = vrot.lane.b32.xlu0 %v1359_v16, %s1259_s26  ;;  %v731_v16 = vsel %vm726_vm3, %v1321_v0, %v351_v61 }
  0x9d   : > { %v393_v53 = vpop.permute.xlu2 %392 }
  0x9e   : > { %v357_v40 = vpop.permute.xlu1 %356  ;;  %v1627_v57 = vsel %vm743_vm2, %v728_v44, %v393_v53  ;;  %v355_v62 = vpop.permute.xlu0 %354 }
  0x9f   : > { %v734_v51 = vsel %vm726_vm3, %v1382_v26, %v357_v40  ;;  %v727_v40 = vsel %vm726_vm3, %v1336_v7, %v343_v30 }
  0xa3   : > { %496 = vrot.lane.b32.xlu2 %v1404_v35, %s1259_s26 }
  0xa4   : > { %494 = vrot.lane.b32.xlu1 %v1407_v36, %s1259_s26  ;;  %492 = vrot.lane.b32.xlu0 %v1369_v21, %s1259_s26 }
  0xa5   : > { %v399_v22 = vpop.permute.xlu2 %398 }
  0xa6   : > { %v363_v8 = vpop.permute.xlu1 %362  ;;  %v1638_v63 = vsel %vm743_vm2, %v731_v16, %v399_v22  ;;  %v361_v38 = vpop.permute.xlu0 %360 }
  0xa7   : > { %v737_v53 = vsel %vm726_vm3, %v1416_v39, %v363_v8  ;;  %v729_v8 = vsel %vm726_vm3, %v1327_v2, %v347_v14  ;;  %v324_v2 = vrot.slane %v1611_v32, 2 }
  0xab   : > { %502 = vrot.lane.b32.xlu2 %v1435_v46, %s1259_s26 }
  0xac   : > { %500 = vrot.lane.b32.xlu1 %v1438_v47, %s1259_s26  ;;  %498 = vrot.lane.b32.xlu0 %v1401_v34, %s1259_s26 }
  0xad   : > { %v405_v9 = vpop.permute.xlu2 %404 }
  0xae   : > { %v369_v61 = vpop.permute.xlu1 %368  ;;  %v1649_v43 = vsel %vm743_vm2, %v734_v51, %v405_v9  ;;  %v367_v44 = vpop.permute.xlu0 %366 }
  0xaf   : > { %v740_v7 = vsel %vm726_vm3, %v1447_v50, %v369_v61  ;;  %v320_v61 = vrot.slane %v1608_v31, 1 }
  0xb3   : > { %508 = vrot.lane.b32.xlu2 %v1470_v59, %s1259_s26 }
  0xb4   : > { %506 = vrot.lane.b32.xlu1 %v1473_v60, %s1259_s26  ;;  %504 = vrot.lane.b32.xlu0 %v1432_v45, %s1259_s26 }
  0xb5   : > { %v411_v16 = vpop.permute.xlu2 %410 }
  0xb6   : > { %v1662_v22 = vsel %vm743_vm2, %v737_v53, %v411_v16  ;;  %v391_v51 = vpop.permute.xlu1 %390  ;;  %v1664_v9 = vpop.permute.xlu0 %372  ;;  %v730_v53 = vsel %vm726_vm3, %v1332_v5, %v349_v27  ;;  %v325_v5 = vrot.slane %v1608_v31, 2  ;;  %v319_v27 = vrot.slane %v1611_v32, 1 }
  0xb7   : > { %v744_v35 = vsel %vm743_vm2, %v727_v40, %v391_v51 }
  0xbb   : > { %558 = vrot.lane.b32.xlu2 %v1582_v15, %s1260_s27 }
  0xbc   : > { %550 = vrot.lane.b32.xlu1 %v1542_v54, %s1260_s27  ;;  %510 = vrot.lane.b32.xlu0 %v1467_v58, %s1259_s26 }
  0xbd   : > { %v417_v30 = vpop.permute.xlu2 %416 }
  0xbe   : > { %v1680_v16 = vsel %vm743_vm2, %v740_v7, %v417_v30  ;;  %v397_v40 = vpop.permute.xlu1 %396  ;;  %v395_v51 = vpop.permute.xlu0 %394  ;;  %v733_v7 = vsel %vm726_vm3, %v1388_v28, %v355_v62  ;;  %v735_v62 = vsel %vm726_vm3, %v1376_v24, %v1600_v18 }
  0xbf   : > { %v747_v45 = vsel %vm743_vm2, %v730_v53, %v397_v40  ;;  %v1684_v26 = vsel %vm743_vm2, %v729_v8, %v395_v51 }
  0xc3   : > { %646 = vrot.lane.b32.xlu2 %v1473_v60, %s1261_s28  ;;  %v732_v60 = vsel %vm726_vm3, %v1324_v1, %v1595_v17  ;;  %v1714_v17 = vsel %vm234_vm0, %v319_v27, %v320_v61 }
  0xc4   : > { %606 = vrot.lane.b32.xlu1 %v1611_v32, %s1262_s29  ;;  %598 = vrot.lane.b32.xlu0 %v1453_v52, %s1262_s29  ;;  %v1709_v32 = vsel %vm275_vm1, %v324_v2, %v325_v5  ;;  %v736_v2 = vsel %vm726_vm3, %v1379_v25, %v361_v38  ;;  %v739_v38 = vsel %vm726_vm3, %v1453_v52, %v367_v44 }
  0xc5   : > { %v439_v14 = vpop.permute.xlu2 %438  ;;  %v741_v52 = vsel %vm726_vm3, %v1441_v48, %v1616_v12 }
  0xc6   : > { %v1702_v30 = vsel %vm760_vm4, %v744_v35, %v439_v14  ;;  %v403_v8 = vpop.permute.xlu1 %402  ;;  %v401_v53 = vpop.permute.xlu0 %400 }
  0xc7   : > { %v750_v40 = vsel %vm743_vm2, %v733_v7, %v403_v8  ;;  %v749_v51 = vsel %vm743_vm2, %v732_v60, %v401_v53 }
  0xcb   : > { %702 = vrot.lane.b32.xlu2 %v1709_v32, %s1263_s30 }
  0xcc   : > { %694 = vrot.lane.b32.xlu1 %v1564_v4, %s1263_s30  ;;  %654 = vrot.lane.b32.xlu0 %v1714_v17, %s1261_s28 }
  0xcd   : > { %v445_v35 = vpop.permute.xlu2 %444 }
  0xce   : > { %v1728_v14 = vsel %vm760_vm4, %v747_v45, %v445_v35  ;;  %v409_v27 = vpop.permute.xlu1 %408  ;;  %v407_v60 = vpop.permute.xlu0 %406  ;;  %v738_v45 = vsel %vm726_vm3, %v1410_v37, %v1605_v19  ;;  %v742_v19 = vsel %vm726_vm3, %v1444_v49, %v1664_v9 }
  0xcf   : > { %v753_v7 = vsel %vm743_vm2, %v736_v2, %v409_v27  ;;  %v752_v8 = vsel %vm743_vm2, %v735_v62, %v407_v60 }
  0xd3   : > { %512 = vrot.lane.b32.xlu2 %v1491_v10, %s1259_s26 }
  0xd4   : > { %542 = vrot.lane.b32.xlu1 %v1525_v41, %s1260_s27  ;;  %534 = vrot.lane.b32.xlu0 %v1509_v29, %s1260_s27 }
  0xd5   : > { %v451_v18 = vpop.permute.xlu2 %450 }
  0xd6   : > { %v1744_v53 = vsel %vm760_vm4, %v750_v40, %v451_v18  ;;  %v415_v35 = vpop.permute.xlu1 %414  ;;  %v413_v62 = vpop.permute.xlu0 %412 }
  0xd7   : > { %v756_v2 = vsel %vm743_vm2, %v739_v38, %v415_v35  ;;  %v755_v27 = vsel %vm743_vm2, %v738_v45, %v413_v62  ;;  %v206_v35 = vld [vmem:[%s1318_s22 + $0xd0] sm:$0x3] }
  0xdb   : > { %552 = vrot.lane.b32.xlu2 %v1567_v6, %s1260_s27 }
  0xdc   : > { %590 = vrot.lane.b32.xlu1 %v1376_v24, %s1262_s29  ;;  %582 = vrot.lane.b32.xlu0 %v1321_v0, %s1262_s29 }
  0xdd   : > { %v457_v29 = vpop.permute.xlu2 %456 }
  0xde   : > { %v1761_v44 = vsel %vm760_vm4, %v753_v7, %v457_v29  ;;  %v421_v40 = vpop.permute.xlu1 %420  ;;  %v419_v60 = vpop.permute.xlu0 %418 }
  0xdf   : > { %v759_v24 = vsel %vm743_vm2, %v742_v19, %v421_v40  ;;  %v758_v18 = vsel %vm743_vm2, %v741_v52, %v419_v60 }
  0xe3   : > { %638 = vrot.lane.b32.xlu2 %v1401_v34, %s1261_s28 }
  0xe4   : > { %630 = vrot.lane.b32.xlu1 %v1348_v13, %s1261_s28  ;;  %560 = vrot.lane.b32.xlu0 %v1579_v11, %s1260_s27  ;;  %v322_v13 = vrot.slane %v206_v35, 1 }
  0xe5   : > { %v463_v0 = vpop.permute.xlu2 %462 }
  0xe6   : > { %v1772_v12 = vsel %vm760_vm4, %v756_v2, %v463_v0  ;;  %v443_v9 = vpop.permute.xlu1 %442  ;;  %v441_v7 = vpop.permute.xlu0 %440  ;;  %v1796_v52 = vsel %vm234_vm0, %v320_v61, %v322_v13 }
  0xe7   : > { %v763_v45 = vsel %vm760_vm4, %v1684_v26, %v443_v9  ;;  %v762_v38 = vsel %vm760_vm4, %v1627_v57, %v441_v7 }
  0xeb   : > { %678 = vrot.lane.b32.xlu2 %v1503_v20, %s1263_s30 }
  0xec   : > { %608 = vrot.lane.b32.xlu1 %v1608_v31, %s1262_s29  ;;  %600 = vrot.lane.b32.xlu0 %v1447_v50, %s1262_s29 }
  0xed   : > { %v469_v34 = vpop.permute.xlu2 %468 }
  0xee   : > { %v1786_v62 = vsel %vm760_vm4, %v759_v24, %v469_v34  ;;  %v449_v2 = vpop.permute.xlu1 %448  ;;  %v447_v26 = vpop.permute.xlu0 %446 }
  0xef   : > { %v766_v29 = vsel %vm760_vm4, %v749_v51, %v449_v2  ;;  %v1791_v57 = vsel %vm760_vm4, %v1638_v63, %v447_v26  ;;  %v327_v51 = vrot.slane %v206_v35, 2  ;;  %v865_v2 = vld [vmem:[%s2164_s1 + $0x18] sm:$0xff] }
  0xf0   : > { %v207_v26 = vld [vmem:[%s1318_s22 + $0xd8] sm:$0xff] }
  0xf3   : > { %656 = vrot.lane.b32.xlu2 %v1796_v52, %s1261_s28 }
  0xf4   : > { %648 = vrot.lane.b32.xlu1 %v1470_v59, %s1261_s28  ;;  %686 = vrot.lane.b32.xlu0 %v1548_v56, %s1263_s30  ;;  %v1817_v59 = vsel %vm275_vm1, %v325_v5, %v327_v51 }
  0xf5   : > { %v491_v50 = vpop.permute.xlu2 %490 }
  0xf6   : > { %v1805_v63 = vsel %vm777_vm5, %v763_v45, %v491_v50  ;;  %v455_v19 = vpop.permute.xlu1 %454  ;;  %v453_v40 = vpop.permute.xlu0 %452  ;;  %v332_v50 = vrot.slane %v207_v26, 1 }
  0xf7   : > { %v1808_v61 = vsel %vm760_vm4, %v752_v8, %v455_v19  ;;  %v1812_v60 = vsel %vm760_vm4, %v1649_v43, %v453_v40 }
  0xfb   : > { %536 = vrot.lane.b32.xlu2 %v1506_v23, %s1260_s27 }
  0xfc   : > { %704 = vrot.lane.b32.xlu1 %v1817_v59, %s1263_s30  ;;  %696 = vrot.lane.b32.xlu0 %v1561_v3, %s1263_s30 }
  0xfd   : > { %v497_v8 = vpop.permute.xlu2 %496 }
  0xfe   : > { %v1826_v24 = vsel %vm777_vm5, %v766_v29, %v497_v8  ;;  %v461_v43 = vpop.permute.xlu1 %460  ;;  %v459_v0 = vpop.permute.xlu0 %458  ;;  %v1900_v29 = vld [vmem:[%s1318_s22 + $0xe0] sm:$0xff] }
  0xff   : > { %v772_v31 = vsel %vm760_vm4, %v755_v27, %v461_v43  ;;  %v1831_v5 = vsel %vm760_vm4, %v1662_v22, %v459_v0  ;;  %v333_v19 = vrot.slane %v1900_v29, 1  ;;  %v862_v43 = vld [vmem:[%s2164_s1] sm:$0xff] }
 0x103   : > { %584 = vrot.lane.b32.xlu2 %v1324_v1, %s1262_s29 }
 0x104   : > { %514 = vrot.lane.b32.xlu1 %v1714_v17, %s1259_s26  ;;  %544 = vrot.lane.b32.xlu0 %v1522_v33, %s1260_s27 }
 0x105   : > { %v1839_v23 = vpop.permute.xlu2 %502 }
 0x106   : > { %v467_v9 = vpop.permute.xlu1 %466  ;;  %v465_v7 = vpop.permute.xlu0 %464 }
 0x107   : > { %v1842_v45 = vsel %vm760_vm4, %v758_v18, %v467_v9  ;;  %v1846_v22 = vsel %vm760_vm4, %v1680_v16, %v465_v7  ;;  %v870_v16 = vld [vmem:[%s2164_s1 + $0x40] sm:$0xff]  ;;  %v334_v9 = vsel %vm234_vm0, %v332_v50, %v333_v19  ;;  %v338_v7 = vrot.slane %v1900_v29, 2 }
 0x108   : > { %1140 = vmatpush.msra.mxu2 %v870_v16  ;;  %1141 = vmatpush.msra.mxu3 %v870_v16 }
 0x109   : > { %927 = vmatpush.msra.mxu0 %v870_v16  ;;  %1139 = vmatpush.msra.mxu1 %v870_v16 }
 0x10b   : > { %562 = vrot.lane.b32.xlu2 %v1709_v32, %s1260_s27 }
 0x10c   : > { %554 = vrot.lane.b32.xlu1 %v1564_v4, %s1260_s27  ;;  %592 = vrot.lane.b32.xlu0 %v1379_v25, %s1262_s29  ;;  %v869_v25 = vld [vmem:[%s2164_s1 + $0x38] sm:$0xff]  ;;  %v868_v4 = vld [vmem:[%s2164_s1 + $0x30] sm:$0xff] }
 0x10d   : > { %v509_v1 = vpop.permute.xlu2 %508  ;;  %1143 = vmatpush.msra.mxu2 %v869_v25  ;;  %1144 = vmatpush.msra.mxu3 %v869_v25 }
 0x10e   : > { %v1855_v17 = vsel %vm777_vm5, %v772_v31, %v509_v1  ;;  %v489_v27 = vpop.permute.xlu1 %488  ;;  %v487_v18 = vpop.permute.xlu0 %486  ;;  %928 = vmatpush.msra.mxu0 %v869_v25  ;;  %1142 = vmatpush.msra.mxu1 %v869_v25 }
 0x10f   : > { %v1861_v35 = vsel %vm777_vm5, %v762_v38, %v489_v27  ;;  %v1865_v32 = vsel %vm777_vm5, %v1702_v30, %v487_v18  ;;  %1146 = vmatpush.msra.mxu2 %v868_v4  ;;  %v867_v30 = vld [vmem:[%s2164_s1 + $0x28] sm:$0xff]  ;;  %1147 = vmatpush.msra.mxu3 %v868_v4 }
 0x110   : > { %929 = vmatpush.msra.mxu0 %v868_v4  ;;  %1145 = vmatpush.msra.mxu1 %v868_v4 }
 0x111   : > { %1149 = vmatpush.msra.mxu2 %v867_v30  ;;  %1150 = vmatpush.msra.mxu3 %v867_v30 }
 0x112   : > { %930 = vmatpush.msra.mxu0 %v867_v30  ;;  %1148 = vmatpush.msra.mxu1 %v867_v30 }
 0x113   : > { %602 = vrot.lane.b32.xlu2 %v1441_v48, %s1262_s29  ;;  %v866_v48 = vld [vmem:[%s2164_s1 + $0x20] sm:$0xff] }
 0x114   : > { %640 = vrot.lane.b32.xlu1 %v1438_v47, %s1261_s28  ;;  %632 = vrot.lane.b32.xlu0 %v1369_v21, %s1261_s28 }
 0x115   : > { %v1882_v38 = vpop.permute.xlu2 %558  ;;  %1152 = vmatpush.msra.mxu2 %v866_v48  ;;  %1153 = vmatpush.msra.mxu3 %v866_v48 }
 0x116   : > { %v495_v13 = vpop.permute.xlu1 %494  ;;  %v493_v34 = vpop.permute.xlu0 %492  ;;  %931 = vmatpush.msra.mxu0 %v866_v48  ;;  %1151 = vmatpush.msra.mxu1 %v866_v48 }
 0x117   : > { %v1889_v21 = vsel %vm777_vm5, %v1791_v57, %v495_v13  ;;  %v1893_v47 = vsel %vm777_vm5, %v1728_v14, %v493_v34  ;;  %1155 = vmatpush.msra.mxu2 %v865_v2  ;;  %v864_v57 = vld [vmem:[%s2164_s1 + $0x10] sm:$0xff]  ;;  %1156 = vmatpush.msra.mxu3 %v865_v2  ;;  %v863_v14 = vld [vmem:[%s2164_s1 + $0x8] sm:$0xff] }
 0x118   : > { %932 = vmatpush.msra.mxu0 %v865_v2  ;;  %1154 = vmatpush.msra.mxu1 %v865_v2 }
 0x119   : > { %1158 = vmatpush.msra.mxu2 %v864_v57  ;;  %1159 = vmatpush.msra.mxu3 %v864_v57 }
 0x11a   : > { %933 = vmatpush.msra.mxu0 %v864_v57  ;;  %1157 = vmatpush.msra.mxu1 %v864_v57 }
 0x11b   : > { %688 = vrot.lane.b32.xlu2 %v1545_v55, %s1263_s30  ;;  %1161 = vmatpush.msra.mxu2 %v863_v14 }
 0x11c   : > { %680 = vrot.lane.b32.xlu1 %v1528_v42, %s1263_s30  ;;  %610 = vrot.lane.b32.xlu0 %v207_v26, %s1262_s29 }
 0x11d   : > { %v1913_v51 = vpop.permute.xlu2 %646  ;;  %1162 = vmatpush.msra.mxu3 %v863_v14  ;;  %1164 = vmatpush.msra.mxu2 %v862_v43 }
 0x11e   : > { %v501_v40 = vpop.permute.xlu1 %500  ;;  %v499_v8 = vpop.permute.xlu0 %498  ;;  %934 = vmatpush.msra.mxu0 %v863_v14  ;;  %1160 = vmatpush.msra.mxu1 %v863_v14 }
 0x11f   : > { %v1921_v0 = vsel %vm777_vm5, %v1812_v60, %v501_v40  ;;  %v1925_v31 = vsel %vm777_vm5, %v1744_v53, %v499_v8  ;;  %1165 = vmatpush.msra.mxu3 %v862_v43  ;;  %v337_v53 = vrot.slane %v207_v26, 2  ;;  %v209_v26 = vld [vmem:[%s1318_s22 + $0xe8] sm:$0x3]  ;;  %s1118_s22 = sshll.u32 %s2188_s9, 4 }
 0x120   : > { %935 = vmatpush.msra.mxu0 %v862_v43  ;;  %1163 = vmatpush.msra.mxu1 %v862_v43  ;;  %v340_v57 = vrot.slane %v209_v26, 2  ;;  %v335_v14 = vrot.slane %v209_v26, 1 }
 0x121   : > { %v339_v16 = vsel %vm275_vm1, %v337_v53, %v338_v7 }
 0x122   : > { %v336_v40 = vsel %vm234_vm0, %v333_v19, %v335_v14 }
 0x123   : > { %698 = vrot.lane.b32.xlu2 %v1582_v15, %s1263_s30 }
 0x124   : > { %658 = vrot.lane.b32.xlu1 %v334_v9, %s1261_s28  ;;  %650 = vrot.lane.b32.xlu0 %v1467_v58, %s1261_s28  ;;  %v2172_v9 = vld [vmem:[#allocation2_spill] sm:$0xff] }
 0x125   : > { %v703_v60 = vpop.permute.xlu2 %702 }
 0x126   : > { %v507_v1 = vpop.permute.xlu1 %506  ;;  %v505_v27 = vpop.permute.xlu0 %504 }
 0x127   : > { %v1938_v18 = vsel %vm777_vm5, %v1831_v5, %v507_v1  ;;  %v1942_v15 = vsel %vm777_vm5, %v1761_v44, %v505_v27  ;;  %v2174_v1 = vld [vmem:[#allocation3_spill] sm:$0xff] }
 0x12b   : > { %546 = vrot.lane.b32.xlu2 %v1548_v56, %s1260_s27 }
 0x12c   : > { %538 = vrot.lane.b32.xlu1 %v1503_v20, %s1260_s27  ;;  %706 = vrot.lane.b32.xlu0 %v339_v16, %s1263_s30  ;;  %v786_v20 = vsel %vm777_vm5, %v1808_v61, %v1839_v23 }
 0x12d   : > { %v1950_v58 = vpop.permute.xlu2 %512 }
 0x12e   : > { %v551_v25 = vpop.permute.xlu1 %550  ;;  %v511_v4 = vpop.permute.xlu0 %510 }
 0x12f   : > { %v803_v30 = vsel %vm794_vm6, %v786_v20, %v551_v25 }
 0x133   : > { %594 = vrot.lane.b32.xlu2 %v1416_v39, %s1262_s29  ;;  %v790_v39 = vsel %vm777_vm5, %v1772_v12, %v511_v4 }
 0x134   : > { %586 = vrot.lane.b32.xlu1 %v1388_v28, %s1262_s29  ;;  %516 = vrot.lane.b32.xlu0 %v1796_v52, %s1259_s26  ;;  %v807_v52 = vsel %vm794_vm6, %v790_v39, %v1882_v38  ;;  %s1119_s26 = sshll.u32 %s2186_s10, 5 }
 0x135   : > { %v1958_v44 = vpop.permute.xlu2 %552 }
 0x136   : > { %v607_v56 = vpop.permute.xlu1 %606  ;;  %v599_v5 = vpop.permute.xlu0 %598 }
 0x137   : > { %v820_v28 = vsel %vm811_vm7, %v803_v30, %v599_v5  ;;  %v824_v12 = vsel %vm811_vm7, %v807_v52, %v607_v56 }
 0x13b   : > { %634 = vrot.lane.b32.xlu2 %v1407_v36, %s1261_s28  ;;  %v837_v36 = vsel %vm828_vm8, %v820_v28, %v1913_v51  ;;  %v341_v51 = vsel %vm275_vm1, %v338_v7, %v340_v57  ;;  %v2173_v7 = vld [vmem:[#allocation4_spill] sm:$0xff] }
 0x13c   : > { %564 = vrot.lane.b32.xlu1 %v1817_v59, %s1260_s27  ;;  %556 = vrot.lane.b32.xlu0 %v1561_v3, %s1260_s27 }
 0x13d   : > { %v639_v61 = vpop.permute.xlu2 %638 }
 0x13e   : > { %v695_v23 = vpop.permute.xlu1 %694  ;;  %v655_v13 = vpop.permute.xlu0 %654 }
 0x13f   : > { %v841_v34 = vsel %vm828_vm8, %v824_v12, %v655_v13  ;;  %v854_v59 = vsel %vm845_vm9, %v837_v36, %v695_v23 }
 0x140   : > { %1129 = vmatmul.msk.f32.vlgmr.msra.gmra.mxu2 %vm871_vm10, %v854_v59  ;;  %v858_v3 = vsel %vm845_vm9, %v841_v34, %v703_v60 }
 0x141   : > { %1133 = vmatmul.msk.f32.vlgmr.msra.gmra.mxu3 %vm871_vm10, %v858_v3 }
 0x143   : > { %612 = vrot.lane.b32.xlu2 %v1900_v29, %s1262_s29 }
 0x144   : > { %604 = vrot.lane.b32.xlu1 %v1444_v49, %s1262_s29  ;;  %642 = vrot.lane.b32.xlu0 %v1435_v46, %s1261_s28 }
 0x145   : > { %v679_v2 = vpop.permute.xlu2 %678 }
 0x146   : > { %v543_v38 = vpop.permute.xlu1 %542  ;;  %v535_v48 = vpop.permute.xlu0 %534 }
 0x147   : > { %v799_v53 = vsel %vm794_vm6, %v1889_v21, %v543_v38  ;;  %v791_v21 = vsel %vm777_vm5, %v1846_v22, %v1950_v58 }
 0x14b   : > { %652 = vrot.lane.b32.xlu2 %v1491_v10, %s1261_s28  ;;  %v795_v10 = vsel %vm794_vm6, %v1865_v32, %v535_v48 }
 0x14c   : > { %690 = vrot.lane.b32.xlu1 %v1542_v54, %s1263_s30  ;;  %682 = vrot.lane.b32.xlu0 %v1525_v41, %s1263_s30 }
 0x14d   : > { %v657_v46 = vpop.permute.xlu2 %656 }
 0x14e   : > { %v591_v50 = vpop.permute.xlu1 %590  ;;  %v583_v49 = vpop.permute.xlu0 %582 }
 0x14f   : > { %v812_v41 = vsel %vm811_vm7, %v795_v10, %v583_v49  ;;  %v816_v60 = vsel %vm811_vm7, %v799_v53, %v591_v50 }
 0x153   : > { %708 = vrot.lane.b32.xlu2 %v341_v51, %s1263_s30 }
 0x154   : > { %700 = vrot.lane.b32.xlu1 %v1579_v11, %s1263_s30  ;;  %660 = vrot.lane.b32.xlu0 %v336_v40, %s1261_s28 }
 0x155   : > { %v537_v19 = vpop.permute.xlu2 %536 }
 0x156   : > { %v631_v54 = vpop.permute.xlu1 %630  ;;  %v561_v8 = vpop.permute.xlu0 %560  ;;  %v796_v38 = vsel %vm794_vm6, %v1861_v35, %v537_v19 }
 0x157   : > { %v829_v43 = vsel %vm828_vm8, %v812_v41, %v631_v54  ;;  %v808_v4 = vsel %vm794_vm6, %v791_v21, %v561_v8 }
 0x158   : > { %v846_v29 = vsel %vm845_vm9, %v829_v43, %v679_v2 }
 0x159   : > { %1121 = vmatmul.msk.f32.vlgmr.msra.gmra.mxu0 %vm871_vm10, %v846_v29 }
 0x15b   : > { %588 = vrot.lane.b32.xlu2 %v2172_v9, %s1262_s29 }
 0x15c   : > { %548 = vrot.lane.b32.xlu1 %v1545_v55, %s1260_s27  ;;  %540 = vrot.lane.b32.xlu0 %v1528_v42, %s1260_s27  ;;  %v833_v42 = vsel %vm828_vm8, %v816_v60, %v639_v61  ;;  %s177_s27 = sadd.s32 %s1119_s26, %s1118_s22 }
 0x15d   : > { %v585_v55 = vpop.permute.xlu2 %584  ;;  %s1120_s9 = sshll.u32 %s177_s27, 3 }
 0x15e   : > { %v609_v11 = vpop.permute.xlu1 %608  ;;  %v601_v32 = vpop.permute.xlu0 %600  ;;  %v813_v48 = vsel %vm811_vm7, %v796_v38, %v585_v55 }
 0x15f   : > { %v825_v56 = vsel %vm811_vm7, %v808_v4, %v609_v11 }
 0x160   : > { %v842_v58 = vsel %vm828_vm8, %v825_v56, %v657_v46 }
 0x163   : > { %644 = vrot.lane.b32.xlu2 %v2173_v7, %s1261_s28 }
 0x164   : > { %636 = vrot.lane.b32.xlu1 %v2174_v1, %s1261_s28  ;;  %596 = vrot.lane.b32.xlu0 %v1410_v37, %s1262_s29  ;;  %v804_v37 = vsel %vm794_vm6, %v1942_v15, %v1958_v44  ;;  %s2095_s29 = scalar_lea.vmem %s2165_s2, %s1120_s9 }
 0x165   : > { %v821_v5 = vsel %vm811_vm7, %v804_v37, %v601_v32  ;;  %v563_v39 = vpop.permute.xlu2 %562 }
 0x166   : > { %v649_v27 = vpop.permute.xlu1 %648  ;;  %v687_v16 = vpop.permute.xlu0 %686 }
 0x167   : > { %v850_v25 = vsel %vm845_vm9, %v833_v42, %v687_v16  ;;  %v838_v20 = vsel %vm828_vm8, %v821_v5, %v649_v27 }
 0x168   : > { %1125 = vmatmul.msk.f32.vlgmr.msra.gmra.mxu1 %vm871_vm10, %v850_v25 }
 0x16c   : > { %692 = vrot.lane.b32.xlu1 %v1567_v6, %s1263_s30  ;;  %684 = vrot.lane.b32.xlu0 %v1522_v33, %s1263_s30 }
 0x16d   : > { %v603_v33 = vpop.permute.xlu2 %602 }
 0x16e   : > { %v705_v30 = vpop.permute.xlu1 %704  ;;  %v697_v22 = vpop.permute.xlu0 %696 }
 0x16f   : > { %v855_v28 = vsel %vm845_vm9, %v838_v20, %v697_v22  ;;  %v859_v52 = vsel %vm845_vm9, %v842_v58, %v705_v30 }
 0x170   : > { %1130 = vmatmul.msk.f32.gmra.mxu2 %vm871_vm10, %v855_v28  ;;  %1134 = vmatmul.msk.f32.gmra.mxu3 %vm871_vm10, %v859_v52 }
 0x175   : > { %v689_v12 = vpop.permute.xlu2 %688 }
 0x176   : > { %v515_v6 = vpop.permute.xlu1 %514  ;;  %v545_v15 = vpop.permute.xlu0 %544 }
 0x177   : > { %v800_v23 = vsel %vm794_vm6, %v1826_v24, %v545_v15  ;;  %v792_v41 = vsel %vm777_vm5, %v1842_v45, %v515_v6 }
 0x178   : > { %v809_v54 = vsel %vm794_vm6, %v792_v41, %v563_v39 }
 0x17d   : > { %v699_v2 = vpop.permute.xlu2 %698 }
 0x17e   : > { %v555_v44 = vpop.permute.xlu1 %554  ;;  %v593_v61 = vpop.permute.xlu0 %592 }
 0x17f   : > { %v817_v13 = vsel %vm811_vm7, %v800_v23, %v593_v61  ;;  %v805_v50 = vsel %vm794_vm6, %v1938_v18, %v555_v44 }
 0x180   : > { %v822_v51 = vsel %vm811_vm7, %v805_v50, %v603_v33 }
 0x185   : > { %v547_v40 = vpop.permute.xlu2 %546 }
 0x186   : > { %v641_v36 = vpop.permute.xlu1 %640  ;;  %v633_v34 = vpop.permute.xlu0 %632  ;;  %v801_v42 = vsel %vm794_vm6, %v1925_v31, %v547_v40 }
 0x187   : > { %v834_v59 = vsel %vm828_vm8, %v817_v13, %v641_v36  ;;  %v830_v26 = vsel %vm828_vm8, %v813_v48, %v633_v34 }
 0x188   : > { %v851_v3 = vsel %vm845_vm9, %v834_v59, %v689_v12 }
 0x189   : > { %1126 = vmatmul.msk.f32.gmra.mxu1 %vm871_vm10, %v851_v3 }
 0x18d   : > { %v595_v9 = vpop.permute.xlu2 %594 }
 0x18e   : > { %v681_v57 = vpop.permute.xlu1 %680  ;;  %v611_v24 = vpop.permute.xlu0 %610  ;;  %v818_v25 = vsel %vm811_vm7, %v801_v42, %v595_v9 }
 0x18f   : > { %v847_v14 = vsel %vm845_vm9, %v830_v26, %v681_v57  ;;  %v826_v8 = vsel %vm811_vm7, %v809_v54, %v611_v24 }
 0x190   : > { %1122 = vmatmul.msk.f32.gmra.mxu0 %vm871_vm10, %v847_v14 }
 0x195   : > { %v635_v45 = vpop.permute.xlu2 %634 }
 0x196   : > { %v659_v49 = vpop.permute.xlu1 %658  ;;  %v651_v46 = vpop.permute.xlu0 %650 }
 0x197   : > { %v839_v35 = vsel %vm828_vm8, %v822_v51, %v651_v46  ;;  %v843_v18 = vsel %vm828_vm8, %v826_v8, %v659_v49 }
 0x198   : > { %v856_v10 = vsel %vm845_vm9, %v839_v35, %v699_v2 }
 0x199   : > { %1131 = vmatmul.msk.f32.gmra.mxu2 %vm871_vm10, %v856_v10 }
 0x19d   : > { %v613_v7 = vpop.permute.xlu2 %612 }
 0x19e   : > { %v539_v43 = vpop.permute.xlu1 %538  ;;  %v707_v29 = vpop.permute.xlu0 %706 }
 0x19f   : > { %v860_v19 = vsel %vm845_vm9, %v843_v18, %v707_v29  ;;  %v797_v27 = vsel %vm794_vm6, %v1805_v63, %v539_v43 }
 0x1a0   : > { %1135 = vmatmul.msk.f32.gmra.mxu3 %vm871_vm10, %v860_v19 }
 0x1a5   : > { %v653_v21 = vpop.permute.xlu2 %652 }
 0x1a6   : > { %v587_v11 = vpop.permute.xlu1 %586  ;;  %v517_v32 = vpop.permute.xlu0 %516 }
 0x1a7   : > { %v814_v16 = vsel %vm811_vm7, %v797_v27, %v587_v11  ;;  %v793_v31 = vsel %vm777_vm5, %v1786_v62, %v517_v32 }
 0x1a8   : > { %v831_v4 = vsel %vm828_vm8, %v814_v16, %v635_v45 }
 0x1ad   : > { %v709_v15 = vpop.permute.xlu2 %708 }
 0x1ae   : > { %v565_v53 = vpop.permute.xlu1 %564  ;;  %v557_v60 = vpop.permute.xlu0 %556 }
 0x1af   : > { %v806_v30 = vsel %vm794_vm6, %v1855_v17, %v557_v60  ;;  %v810_v22 = vsel %vm794_vm6, %v793_v31, %v565_v53 }
 0x1b0   : > { %v827_v62 = vsel %vm811_vm7, %v810_v22, %v613_v7 }
 0x1b5   : > { %v589_v34 = vpop.permute.xlu2 %588 }
 0x1b6   : > { %v605_v1 = vpop.permute.xlu1 %604  ;;  %v643_v55 = vpop.permute.xlu0 %642 }
 0x1b7   : > { %v835_v56 = vsel %vm828_vm8, %v818_v25, %v643_v55  ;;  %v823_v58 = vsel %vm811_vm7, %v806_v30, %v605_v1 }
 0x1b8   : > { %v840_v17 = vsel %vm828_vm8, %v823_v58, %v653_v21 }
 0x1bd   : > { %v645_v24 = vpop.permute.xlu2 %644 }
 0x1be   : > { %v691_v37 = vpop.permute.xlu1 %690  ;;  %v683_v5 = vpop.permute.xlu0 %682 }
 0x1bf   : > { %v848_v20 = vsel %vm845_vm9, %v831_v4, %v683_v5  ;;  %v852_v63 = vsel %vm845_vm9, %v835_v56, %v691_v37 }
 0x1c0   : > { %1123 = vmatmul.msk.f32.gmra.mxu0 %vm871_vm10, %v848_v20  ;;  %1127 = vmatmul.msk.f32.gmra.mxu1 %vm871_vm10, %v852_v63 }
 0x1c3   : > { %v961_v39 = vpop.f32.mrf.mxu2 }
 0x1c4   : > { %v993_v28 = vmax.f32 %v961_v39, 0.0  ;;  %v973_v52 = vpop.f32.mrf.mxu3 }
 0x1c5   : > { %v997_v6 = vmax.f32 %v973_v52, 0.0 }
 0x1c6   : > { %1009 = vst.msk [vmem:[%s2095_s29 + $0x40] sm:$0xff] %vm743_vm2, %v993_v28  ;;  %v701_v33 = vpop.permute.xlu1 %700  ;;  %v661_v44 = vpop.permute.xlu0 %660 }
 0x1c7   : > { %1013 = vst.msk [vmem:[%s2095_s29 + $0x60] sm:$0xff] %vm743_vm2, %v997_v6  ;;  %v844_v61 = vsel %vm828_vm8, %v827_v62, %v661_v44  ;;  %v857_v12 = vsel %vm845_vm9, %v840_v17, %v701_v33 }
 0x1c8   : > { %1132 = vmatmul.msk.f32.gmra.mxu2 %vm871_vm10, %v857_v12  ;;  %v861_v23 = vsel %vm845_vm9, %v844_v61, %v709_v15 }
 0x1c9   : > { %1136 = vmatmul.msk.f32.gmra.mxu3 %vm871_vm10, %v861_v23 }
 0x1ce   : > { %v549_v13 = vpop.permute.xlu1 %548  ;;  %v541_v36 = vpop.permute.xlu0 %540 }
 0x1cf   : > { %v802_v2 = vsel %vm794_vm6, %v1921_v0, %v549_v13  ;;  %v798_v26 = vsel %vm794_vm6, %v1893_v47, %v541_v36 }
 0x1d0   : > { %v815_v14 = vsel %vm811_vm7, %v798_v26, %v589_v34 }
 0x1d6   : > { %v637_v59 = vpop.permute.xlu1 %636  ;;  %v937_v3 = vpop.f32.mrf.mxu0 }
 0x1d7   : > { %v985_v38 = vmax.f32 %v937_v3, 0.0  ;;  %v597_v48 = vpop.permute.xlu0 %596  ;;  %v832_v51 = vsel %vm828_vm8, %v815_v14, %v637_v59 }
 0x1d8   : > { %v819_v57 = vsel %vm811_vm7, %v802_v2, %v597_v48 }
 0x1d9   : > { %1001 = vst.msk [vmem:[%s2095_s29] sm:$0xff] %vm743_vm2, %v985_v38  ;;  %v836_v50 = vsel %vm828_vm8, %v819_v57, %v645_v24 }
 0x1de   : > { %v693_v49 = vpop.permute.xlu1 %692 }
 0x1df   : > { %v685_v46 = vpop.permute.xlu0 %684  ;;  %v853_v40 = vsel %vm845_vm9, %v836_v50, %v693_v49 }
 0x1e0   : > { %v849_v0 = vsel %vm845_vm9, %v832_v51, %v685_v46  ;;  %1128 = vmatmul.msk.f32.gmra.mxu1 %vm871_vm10, %v853_v40 }
 0x1e1   : > { %1124 = vmatmul.msk.f32.gmra.mxu0 %vm871_vm10, %v849_v0 }
 0x1e5   : > { %v949_v47 = vpop.f32.mrf.mxu1 }
 0x1e6   : > { %v989_v35 = vmax.f32 %v949_v47, 0.0 }
 0x1e8   : > { %1005 = vst.msk [vmem:[%s2095_s29 + $0x20] sm:$0xff] %vm743_vm2, %v989_v35 }
 0x1f3   : > { %v964_v10 = vpop.f32.mrf.mxu2  ;;  %v976_v41 = vpop.f32.mrf.mxu3 }
 0x1f4   : > { %v994_v54 = vmax.f32 %v964_v10, 0.0  ;;  %v998_v8 = vmax.f32 %v976_v41, 0.0 }
 0x1f6   : > { %1010 = vst.msk [vmem:[%s2095_s29 + $0x48] sm:$0xff] %vm743_vm2, %v994_v54 }
 0x1f7   : > { %1014 = vst.msk [vmem:[%s2095_s29 + $0x68] sm:$0xff] %vm743_vm2, %v998_v8 }
 0x206   : > { %v952_v18 = vpop.f32.mrf.mxu1 }
 0x207   : > { %v990_v43 = vmax.f32 %v952_v18, 0.0 }
 0x209   : > { %1006 = vst.msk [vmem:[%s2095_s29 + $0x28] sm:$0xff] %vm743_vm2, %v990_v43 }
 0x20d   : > { %v940_v29 = vpop.f32.mrf.mxu0 }
 0x20e   : > { %v986_v19 = vmax.f32 %v940_v29, 0.0 }
 0x210   : > { %1002 = vst.msk [vmem:[%s2095_s29 + $0x8] sm:$0xff] %vm743_vm2, %v986_v19 }
 0x21c   : > { %v967_v9 = vpop.f32.mrf.mxu2 }
 0x21d   : > { %v995_v11 = vmax.f32 %v967_v9, 0.0 }
 0x21f   : > { %1011 = vst.msk [vmem:[%s2095_s29 + $0x50] sm:$0xff] %vm743_vm2, %v995_v11 }
 0x223   : > { %v979_v32 = vpop.f32.mrf.mxu3 }
 0x224   : > { %v999_v45 = vmax.f32 %v979_v32, 0.0 }
 0x226   : > { %1015 = vst.msk [vmem:[%s2095_s29 + $0x70] sm:$0xff] %vm743_vm2, %v999_v45 }
 0x23d   : > { %v943_v53 = vpop.f32.mrf.mxu0  ;;  %v955_v60 = vpop.f32.mrf.mxu1 }
 0x23e   : > { %v987_v7 = vmax.f32 %v943_v53, 0.0  ;;  %v991_v1 = vmax.f32 %v955_v60, 0.0 }
 0x240   : > { %1003 = vst.msk [vmem:[%s2095_s29 + $0x10] sm:$0xff] %vm743_vm2, %v987_v7 }
 0x241   : > { %1007 = vst.msk [vmem:[%s2095_s29 + $0x30] sm:$0xff] %vm743_vm2, %v991_v1 }
 0x24b   : > { %v970_v55 = vpop.f32.mrf.mxu2 }
 0x24c   : > { %v996_v27 = vmax.f32 %v970_v55, 0.0  ;;  %v982_v16 = vpop.f32.mrf.mxu3 }
 0x24d   : > { %v1000_v42 = vmax.f32 %v982_v16, 0.0 }
 0x24e   : > { %1012 = vst.msk [vmem:[%s2095_s29 + $0x58] sm:$0xff] %vm743_vm2, %v996_v27 }
 0x24f   : > { %1016 = vst.msk [vmem:[%s2095_s29 + $0x78] sm:$0xff] %vm743_vm2, %v1000_v42 }
 0x25d   : > { %v958_v25 = vpop.f32.mrf.mxu1 }
 0x25e   : > { %v946_v21 = vpop.f32.mrf.mxu0  ;;  %v992_v4 = vmax.f32 %v958_v25, 0.0 }
 0x25f   : > { %v988_v56 = vmax.f32 %v946_v21, 0.0 }
 0x260   : > { %1008 = vst.msk [vmem:[%s2095_s29 + $0x38] sm:$0xff] %vm743_vm2, %v992_v4 }
 0x261   : > { %1004 = vst.msk [vmem:[%s2095_s29 + $0x18] sm:$0xff] %vm743_vm2, %v988_v56 }
 0x262 PF: > { %s12_s13 = sadd.s32 1, %s1254_s13   ;;  %s2175_s9 = smov %s1246_s11 }
 0x263   : > { %p9_p7 = scmp.ge.s32.totalorder %s12_s13, 6   ;;  %s2176_s10 = smov %s1250_s12 }
 0x264   : > { %s2177_s11 = smov %s2180_s14  ;;  %s2178_s12 = smov %s2184_s15 }
 0x265   :  { %11 = sbr.rel (!%p9_p7) target bundleno = 3 (0x3), region = 58 }

</bundles_post_ra>
